<compile_context>
chip_gen: v7x
topology: tpu7x:2x2x1
jax: 0.10.0
libtpu: 0.0.40
codegen_flags: <defaults>
</compile_context>

<pallas_src>
import jax
import jax.numpy as jnp
import numpy as np
from jax.experimental import pallas as pl
from jax.experimental.pallas import tpu as pltpu


def _shortcut_kernel(x_ref, sel_ref, o_ref):
    # x_ref:   (TN, C, K)       K = H_pad * W_pad (flattened spatial, lane-dense)
    # sel_ref: (K, HW_out)      0/1 spatial-subsample selection matrix
    # o_ref:   (TN, C_out, HW)  HW = H_out * W_out (lane-dense output)
    tn, c, _ = x_ref.shape
    c_out, hw = o_ref.shape[1], o_ref.shape[2]
    pad = (c_out - c) // 2

    # Zero only the channel-pad slabs (each output element written exactly once).
    if pad > 0:
        zeros = jnp.zeros((tn, pad, hw), dtype=o_ref.dtype)
        o_ref[:, :pad, :] = zeros
        o_ref[:, pad + c:, :] = zeros

    sel = sel_ref[...]
    # Static unroll over input channels (C <= 64 for these CIFAR ResNets) so
    # every matmul is a plain 2D (TN, K) x (K, HW) MXU op.
    for cc in range(c):
        sub = jnp.dot(x_ref[:, cc, :], sel, preferred_element_type=jnp.float32)
        o_ref[:, pad + cc, :] = sub.astype(o_ref.dtype)


def lambda_layer_option_a(x, planes, *, vmem_budget_bytes=8 * 1024 * 1024):
    """Option-A shortcut: x (N,C,H,W) -> (N, C+2*(planes//4), ceil(H/2), ceil(W/2))."""
    n, c, h, w = x.shape
    pad = planes // 4
    h_out, w_out = (h + 1) // 2, (w + 1) // 2
    c_out = c + 2 * pad
    hw = h_out * w_out

    # Pad spatial dims to even (odd rows/cols are never selected anyway).
    h_pad, w_pad = 2 * h_out, 2 * w_out
    if (h_pad, w_pad) != (h, w):
        x = jnp.pad(x, ((0, 0), (0, 0), (0, h_pad - h), (0, w_pad - w)))
    k = h_pad * w_pad

    # Free (row-major) reshape: spatial dims flattened onto the lane axis.
    x3 = x.reshape(n, c, k)

    # 0/1 selection matrix: output position m = i*w_out + j picks flat source
    # index 2*i*w_pad + 2*j, i.e. x[..., 2i, 2j].
    m = jnp.arange(hw, dtype=jnp.int32)
    src = (m // w_out) * (2 * w_pad) + (m % w_out) * 2
    sel = (jnp.arange(k, dtype=jnp.int32)[:, None] == src[None, :]).astype(x.dtype)

    # Batch tile size from a VMEM budget (double-buffered blocks stay well under
    # 32 MiB on every generation); keep >= 2 grid steps when possible so the
    # grid can shard across v7x's two TensorCores.
    itemsize = np.dtype(x.dtype).itemsize
    per_image = (c * k + c_out * hw) * itemsize
    tn = max(1, min(n, vmem_budget_bytes // per_image))
    if n > 1:
        tn = min(tn, (n + 1) // 2)
    grid = (pl.cdiv(n, tn),)

    out3 = pl.pallas_call(
        _shortcut_kernel,
        out_shape=jax.ShapeDtypeStruct((n, c_out, hw), x.dtype),
        grid=grid,
        in_specs=[
            pl.BlockSpec((tn, c, k), lambda i: (i, 0, 0)),
            pl.BlockSpec((k, hw), lambda i: (0, 0)),   # resident across steps
        ],
        out_specs=pl.BlockSpec((tn, c_out, hw), lambda i: (i, 0, 0)),
        compiler_params=pltpu.CompilerParams(
            dimension_semantics=("parallel",),
            vmem_limit_bytes=32 * 1024 * 1024,
        ),
    )(x3, sel)

    # Free reshape back to NCHW layout.
    return out3.reshape(n, c_out, h_out, w_out)


def _reference(x, planes):
    pad = planes // 4
    sub = x[:, :, ::2, ::2]
    return jnp.pad(sub, ((0, 0), (pad, pad), (0, 0), (0, 0)))


if __name__ == "__main__":
    key = jax.random.PRNGKey(0)
    # N=2, C=4 input channels, 16x16 spatial; planes=8 => pad 2 channels each side.
    x = jax.random.normal(key, (2, 4, 16, 16), dtype=jnp.float32)
    # Use bf16-representable f32 values so the MXU-based selection is bit-exact
    # against the reference regardless of the compiler's f32 matmul pass count.
    x = x.astype(jnp.bfloat16).astype(jnp.float32)
    planes = 8

    out = jax.block_until_ready(lambda_layer_option_a(x, planes))

    ref = _reference(x, planes)
    assert out.shape == ref.shape, (out.shape, ref.shape)
    np.testing.assert_allclose(np.asarray(out), np.asarray(ref), rtol=1e-6, atol=1e-6)
    print("KERNEL_OK")
</pallas_src>

<mosaic_0001>
module attributes {stable_mosaic.version = 11 : i64} {
  func.func @_shortcut_kernel(%arg0: i32, %arg1: memref<1x4x256xf32, #tpu.memory_space<vmem>>, %arg2: memref<256x64xf32, #tpu.memory_space<vmem>>, %arg3: memref<1x8x64xf32, #tpu.memory_space<vmem>>) attributes {dimension_semantics = [#tpu.dimension_semantics<parallel>], iteration_bounds = array<i64: 2>, scalar_prefetch = 0 : i64, scratch_operands = 0 : i64, tpu.core_type = #tpu.core_type<tc>, window_params = [{transform_indices = @transform_0, window_bounds = array<i64: 1, 4, 256>}, {pipeline_mode = #tpu.pipeline_mode<synchronous>, transform_indices = @transform_1, window_bounds = array<i64: 256, 64>}, {transform_indices = @transform_2, window_bounds = array<i64: 1, 8, 64>}]} {
    %cst = arith.constant 0.000000e+00 : f32
    %0 = vector.broadcast %cst : f32 to vector<1x2x64xf32>
    %c0 = arith.constant 0 : index
    %c0_0 = arith.constant 0 : index
    %c0_1 = arith.constant 0 : index
    %1 = vector.load %arg3[%c0, %c0_0, %c0_1] : memref<1x8x64xf32, #tpu.memory_space<vmem>>, vector<1x2x64xf32>
    tpu.vector_store %arg3[%c0, %c0_0, %c0_1], %0 {strides = array<i32>} : memref<1x8x64xf32, #tpu.memory_space<vmem>>, vector<1x2x64xf32>,
    %c0_2 = arith.constant 0 : index
    %c6 = arith.constant 6 : index
    %c0_3 = arith.constant 0 : index
    %2 = vector.load %arg3[%c0_2, %c6, %c0_3] : memref<1x8x64xf32, #tpu.memory_space<vmem>>, vector<1x2x64xf32>
    tpu.vector_store %arg3[%c0_2, %c6, %c0_3], %0 {strides = array<i32>} : memref<1x8x64xf32, #tpu.memory_space<vmem>>, vector<1x2x64xf32>,
    %c0_4 = arith.constant 0 : index
    %c0_5 = arith.constant 0 : index
    %3 = vector.load %arg2[%c0_4, %c0_5] : memref<256x64xf32, #tpu.memory_space<vmem>>, vector<256x64xf32>
    %c0_6 = arith.constant 0 : index
    %c0_7 = arith.constant 0 : index
    %c0_8 = arith.constant 0 : index
    %4 = vector.load %arg1[%c0_6, %c0_7, %c0_8] : memref<1x4x256xf32, #tpu.memory_space<vmem>>, vector<1x1x256xf32>
    %5 = vector.shape_cast %4 : vector<1x1x256xf32> to vector<1x256xf32>
    %cst_9 = arith.constant dense<0.000000e+00> : vector<1x64xf32>
    %6 = tpu.matmul %5, %3, %cst_9 {dimension_numbers = #tpu.dot_dimension_numbers<[1], [0], [0], [1], [0, 0, 1, 1], [], []>} : vector<1x256xf32>, vector<256x64xf32>, vector<1x64xf32> -> vector<1x64xf32>
    %c0_10 = arith.constant 0 : index
    %c2 = arith.constant 2 : index
    %c0_11 = arith.constant 0 : index
    %7 = vector.load %arg3[%c0_10, %c2, %c0_11] : memref<1x8x64xf32, #tpu.memory_space<vmem>>, vector<1x1x64xf32>
    %8 = vector.shape_cast %7 : vector<1x1x64xf32> to vector<1x64xf32>
    %9 = vector.shape_cast %6 : vector<1x64xf32> to vector<1x1x64xf32>
    tpu.vector_store %arg3[%c0_10, %c2, %c0_11], %9 {strides = array<i32>} : memref<1x8x64xf32, #tpu.memory_space<vmem>>, vector<1x1x64xf32>,
    %c0_12 = arith.constant 0 : index
    %c1 = arith.constant 1 : index
    %c0_13 = arith.constant 0 : index
    %10 = vector.load %arg1[%c0_12, %c1, %c0_13] : memref<1x4x256xf32, #tpu.memory_space<vmem>>, vector<1x1x256xf32>
    %11 = vector.shape_cast %10 : vector<1x1x256xf32> to vector<1x256xf32>
    %cst_14 = arith.constant dense<0.000000e+00> : vector<1x64xf32>
    %12 = tpu.matmul %11, %3, %cst_14 {dimension_numbers = #tpu.dot_dimension_numbers<[1], [0], [0], [1], [0, 0, 1, 1], [], []>} : vector<1x256xf32>, vector<256x64xf32>, vector<1x64xf32> -> vector<1x64xf32>
    %c0_15 = arith.constant 0 : index
    %c3 = arith.constant 3 : index
    %c0_16 = arith.constant 0 : index
    %13 = vector.load %arg3[%c0_15, %c3, %c0_16] : memref<1x8x64xf32, #tpu.memory_space<vmem>>, vector<1x1x64xf32>
    %14 = vector.shape_cast %13 : vector<1x1x64xf32> to vector<1x64xf32>
    %15 = vector.shape_cast %12 : vector<1x64xf32> to vector<1x1x64xf32>
    tpu.vector_store %arg3[%c0_15, %c3, %c0_16], %15 {strides = array<i32>} : memref<1x8x64xf32, #tpu.memory_space<vmem>>, vector<1x1x64xf32>,
    %c0_17 = arith.constant 0 : index
    %c2_18 = arith.constant 2 : index
    %c0_19 = arith.constant 0 : index
    %16 = vector.load %arg1[%c0_17, %c2_18, %c0_19] : memref<1x4x256xf32, #tpu.memory_space<vmem>>, vector<1x1x256xf32>
    %17 = vector.shape_cast %16 : vector<1x1x256xf32> to vector<1x256xf32>
    %cst_20 = arith.constant dense<0.000000e+00> : vector<1x64xf32>
    %18 = tpu.matmul %17, %3, %cst_20 {dimension_numbers = #tpu.dot_dimension_numbers<[1], [0], [0], [1], [0, 0, 1, 1], [], []>} : vector<1x256xf32>, vector<256x64xf32>, vector<1x64xf32> -> vector<1x64xf32>
    %c0_21 = arith.constant 0 : index
    %c4 = arith.constant 4 : index
    %c0_22 = arith.constant 0 : index
    %19 = vector.load %arg3[%c0_21, %c4, %c0_22] : memref<1x8x64xf32, #tpu.memory_space<vmem>>, vector<1x1x64xf32>
    %20 = vector.shape_cast %19 : vector<1x1x64xf32> to vector<1x64xf32>
    %21 = vector.shape_cast %18 : vector<1x64xf32> to vector<1x1x64xf32>
    tpu.vector_store %arg3[%c0_21, %c4, %c0_22], %21 {strides = array<i32>} : memref<1x8x64xf32, #tpu.memory_space<vmem>>, vector<1x1x64xf32>,
    %c0_23 = arith.constant 0 : index
    %c3_24 = arith.constant 3 : index
    %c0_25 = arith.constant 0 : index
    %22 = vector.load %arg1[%c0_23, %c3_24, %c0_25] : memref<1x4x256xf32, #tpu.memory_space<vmem>>, vector<1x1x256xf32>
    %23 = vector.shape_cast %22 : vector<1x1x256xf32> to vector<1x256xf32>
    %cst_26 = arith.constant dense<0.000000e+00> : vector<1x64xf32>
    %24 = tpu.matmul %23, %3, %cst_26 {dimension_numbers = #tpu.dot_dimension_numbers<[1], [0], [0], [1], [0, 0, 1, 1], [], []>} : vector<1x256xf32>, vector<256x64xf32>, vector<1x64xf32> -> vector<1x64xf32>
    %c0_27 = arith.constant 0 : index
    %c5 = arith.constant 5 : index
    %c0_28 = arith.constant 0 : index
    %25 = vector.load %arg3[%c0_27, %c5, %c0_28] : memref<1x8x64xf32, #tpu.memory_space<vmem>>, vector<1x1x64xf32>
    %26 = vector.shape_cast %25 : vector<1x1x64xf32> to vector<1x64xf32>
    %27 = vector.shape_cast %24 : vector<1x64xf32> to vector<1x1x64xf32>
    tpu.vector_store %arg3[%c0_27, %c5, %c0_28], %27 {strides = array<i32>} : memref<1x8x64xf32, #tpu.memory_space<vmem>>, vector<1x1x64xf32>,
    return
  }
  func.func @transform_0(%arg0: i32) -> (i32, i32, i32) {
    %c0_i32 = arith.constant 0 : i32
    %c0_i32_0 = arith.constant 0 : i32
    %c0_i32_1 = arith.constant 0 : i32
    return %arg0, %c0_i32, %c0_i32_0 : i32, i32, i32
  }
  func.func @transform_1(%arg0: i32) -> (i32, i32) {
    %c0_i32 = arith.constant 0 : i32
    %c0_i32_0 = arith.constant 0 : i32
    %c0_i32_1 = arith.constant 0 : i32
    return %c0_i32, %c0_i32_0 : i32, i32
  }
  func.func @transform_2(%arg0: i32) -> (i32, i32, i32) {
    %c0_i32 = arith.constant 0 : i32
    %c0_i32_0 = arith.constant 0 : i32
    %c0_i32_1 = arith.constant 0 : i32
    return %arg0, %c0_i32, %c0_i32_0 : i32, i32, i32
  }
}

</mosaic_0001>

<bundles_post_ra>
// kernel: tpu_custom_call.1
= control target key start
LH: loop header
LB: loop body
LE: loop exit
PB: predicated region body
PF: predicated region fallthrough
CT: control target
= control target key end

     0   :  { %7 = vsyncpa [#allocation3], 0  ;;  %s1260_s0 = inlined_call_operand.vmem [shape: f32[2,4,256], index: 0, kind: input, shape index: {}]   ;;  %s1261_s1 = inlined_call_operand.vmem [shape: f32[256,64], index: 1, kind: input, shape index: {}]   ;;  %s1262_s2 = inlined_call_operand.hbm [shape: f32[2,8,64], index: 2, kind: output, shape index: {}]  }
   0x1   :  { %9 = vsyncpa [#allocation3 + $0x1], 0  ;;  %s990_s9 = smov 0   ;;  %s992_s10 = smov 0  }
   0x2   :  { %s994_s11 = smov 0   ;;  %s996_s12 = smov 0  }
   0x3 LB: > { %s1011_s13 = sadd.s32 4294967295, %s971_s12   ;;  %s586_s14 = sadd.s32 4294967294, %s971_s12   ;;  %s971_s12 = sphi %s996_s12, %s1268_s12   ;;  %s967_s11 = sphi %s994_s11, %s1267_s11   ;;  %s963_s10 = sphi %s992_s10, %s1266_s10   ;;  %s959_s9 = sphi %s990_s9, %s1265_s9  }
   0x4   : > { %s1015_s15 = sadd.s32 1, %s971_s12   ;;  %s69_s16 = sadd.s32 1, %s967_s11 }
   0x5   : > { %s66_s17 = ssub.s32 %s971_s12, %s1015_s15  ;;  %p79_p0 = scmp.ne.s32.totalorder %s967_s11, %s963_s10 }
   0x6   : > { %p67_p1 = scmp.eq.s32.totalorder %s66_s17, 0  ;;  %p80_p2 = scmp.eq.s32.totalorder %s1011_s13, 1 }
   0x7   : > { %p85_p3 = scmp.ne.s32.totalorder %s963_s10, %s959_s9  ;;  %p86_p4 = scmp.eq.s32.totalorder %s586_s14, 1 }
   0x8   : > { %s1026_s18 = scalar_select %p67_p1, %s967_s11, %s69_s16  }
   0x9   : > { %p1028_p5 = por %p80_p2, %p79_p0  ;;  %p1032_p6 = por %p86_p4, %p85_p3 }
   0xa   : > { %p589_p7 = scmp.ge.s32.totalorder %s971_s12, 1  ;;  %p115_p8 = scmp.lt.s32.totalorder %s971_s12, 3 }
   0xc   : > { %p116_p9 = pnand %p589_p7, %p115_p8 }
   0xd   : > { %v161_v0 = vld [vmem:[%s1261_s1 + $0x80] sm:$0xff] (!%p116_p9)  ;;  %v162_v1 = vld [vmem:[%s1261_s1 + $0x88] sm:$0xff] (!%p116_p9)  ;;  %p137_p10 = scmp.lt.s32.totalorder (!%p116_p9), %s1011_s13, 1  ;;  %v179_v3 = vlaneseq (!%p116_p9)  ;;  %v163_v6 = vld [vmem:[%s1261_s1 + $0x90] sm:$0xff] (!%p116_p9)  ;;  %vm142_vm0 = vcmask (!%p116_p9), 517120   ;;  %vm259_vm1 = vcmask (!%p116_p9), 516096  }
   0xe   : > { %119 = sbr.rel (%p116_p9) target bundleno = 309 (0x135), region = 28  ;;  %v145_v2 = vld [vmem:[%s1261_s1] sm:$0xff] (!%p116_p9)  ;;  %v1048_v4 = vpack.c.bf16 (!%p116_p9), %v162_v1, %v161_v0  ;;  %v146_v5 = vld [vmem:[%s1261_s1 + $0x8] sm:$0xff] (!%p116_p9)  ;;  %v164_v7 = vld [vmem:[%s1261_s1 + $0x98] sm:$0xff] (!%p116_p9)  ;;  %v973_v0 = vmov (!%p116_p9), 0.0   ;;  %s597_s14 = sshll.u32 (!%p116_p9), %s1011_s13, 7 }
   0xf   : > { %v1059_v8 = vpack.c.bf16 (!%p116_p9), %v146_v5, %v145_v2  ;;  %v1061_v9 = vpack.c.bf16 (!%p116_p9), %v164_v7, %v163_v6  ;;  %v147_v10 = vld [vmem:[%s1261_s1 + $0x10] sm:$0xff] (!%p116_p9)  ;;  %v148_v11 = vld [vmem:[%s1261_s1 + $0x18] sm:$0xff] (!%p116_p9)  ;;  %v165_v12 = vld [vmem:[%s1261_s1 + $0xa0] sm:$0xff] (!%p116_p9)  ;;  %v1078_v14 = vshrl.u32 (!%p116_p9), %v179_v3, 7  ;;  %s1216_s22 = scalar_lea.hbm (!%p116_p9), %s1262_s2, %s597_s14  ;;  %s974_s24 = smov (!%p116_p9), [#allocation2]  }
  0x10   : > { %742 = vmatprep.subr.bf16.mxu0 (!%p116_p9), %v1048_v4  ;;  %774 = vmatprep.subr.bf16.mxu1 (!%p116_p9), %v1048_v4  ;;  %v166_v13 = vld [vmem:[%s1261_s1 + $0xa8] sm:$0xff] (!%p116_p9)  ;;  %v1082_v15 = vpack.c.bf16 (!%p116_p9), %v148_v11, %v147_v10  ;;  %v149_v17 = vld [vmem:[%s1261_s1 + $0x20] sm:$0xff] (!%p116_p9)  ;;  %v167_v19 = vld [vmem:[%s1261_s1 + $0xb0] sm:$0xff] (!%p116_p9)  ;;  %s913_s25 = sshll.u32 (!%p116_p9), %s974_s24, 4  ;;  %s914_s25 = int_to_ptr.vmem [resolvable:$false] %s913_s25 }
  0x11   : > { %744 = vmatpush3.bf16.msra.mxu0 (!%p116_p9), %v1059_v8  ;;  %776 = vmatpush3.bf16.msra.mxu1 (!%p116_p9), %v1059_v8  ;;  %v1086_v16 = vpack.c.bf16 (!%p116_p9), %v166_v13, %v165_v12  ;;  %v150_v18 = vld [vmem:[%s1261_s1 + $0x28] sm:$0xff] (!%p116_p9)  ;;  %v168_v20 = vld [vmem:[%s1261_s1 + $0xb8] sm:$0xff] (!%p116_p9)  ;;  %v1106_v21 = vsub.s32 (!%p116_p9), 1, %v1078_v14  ;;  %v151_v24 = vld [vmem:[%s1261_s1 + $0x30] sm:$0xff] (!%p116_p9)  ;;  %v181_v54 = vsub.s32 (!%p116_p9), 0, %v1078_v14  ;;  %s915_s26 = scalar_lea.vmem (!%p116_p9), %s914_s25, 256 }
  0x12   : > { %746 = vmatprep.subr.bf16.mxu0 (!%p116_p9), %v1061_v9  ;;  %778 = vmatprep.subr.bf16.mxu1 (!%p116_p9), %v1061_v9  ;;  %v1110_v22 = vpack.c.bf16 (!%p116_p9), %v150_v18, %v149_v17  ;;  %v1114_v23 = vpack.c.bf16 (!%p116_p9), %v168_v20, %v167_v19  ;;  %v152_v25 = vld [vmem:[%s1261_s1 + $0x38] sm:$0xff] (!%p116_p9)  ;;  %v169_v26 = vld [vmem:[%s1261_s1 + $0xc0] sm:$0xff] (!%p116_p9)  ;;  %v170_v27 = vld [vmem:[%s1261_s1 + $0xc8] sm:$0xff] (!%p116_p9) }
  0x13   : > { %v1133_v31 = vpack.c.bf16 (!%p116_p9), %v152_v25, %v151_v24  ;;  %v1138_v33 = vpack.c.bf16 (!%p116_p9), %v170_v27, %v169_v26  ;;  %v153_v34 = vld [vmem:[%s1261_s1 + $0x40] sm:$0xff] (!%p116_p9)  ;;  %v154_v35 = vld [vmem:[%s1261_s1 + $0x48] sm:$0xff] (!%p116_p9)  ;;  %v171_v36 = vld [vmem:[%s1261_s1 + $0xd0] sm:$0xff] (!%p116_p9) }
  0x14   : > { %v172_v37 = vld [vmem:[%s1261_s1 + $0xd8] sm:$0xff] (!%p116_p9)  ;;  %v759_v38 = vpack.c.bf16 (!%p116_p9), %v154_v35, %v153_v34  ;;  %v155_v40 = vld [vmem:[%s1261_s1 + $0x50] sm:$0xff] (!%p116_p9)  ;;  %v173_v42 = vld [vmem:[%s1261_s1 + $0xe0] sm:$0xff] (!%p116_p9) }
  0x15   : > { %s138_s17 = scalar_select %p137_p10, %s1011_s13, 1  ;;  %748 = vmatpush3.bf16.msra.mxu0 %v1082_v15  ;;  %780 = vmatpush3.bf16.msra.mxu1 %v1082_v15  ;;  %v761_v39 = vpack.c.bf16 %v172_v37, %v171_v36  ;;  %v156_v41 = vld [vmem:[%s1261_s1 + $0x58] sm:$0xff]  ;;  %v174_v43 = vld [vmem:[%s1261_s1 + $0xe8] sm:$0xff]  ;;  %v157_v46 = vld [vmem:[%s1261_s1 + $0x60] sm:$0xff] }
  0x16   : > { %750 = vmatprep.subr.bf16.mxu0 %v1086_v16  ;;  %782 = vmatprep.subr.bf16.mxu1 %v1086_v16  ;;  %v763_v44 = vpack.c.bf16 %v156_v41, %v155_v40  ;;  %v765_v45 = vpack.c.bf16 %v174_v43, %v173_v42  ;;  %v158_v47 = vld [vmem:[%s1261_s1 + $0x68] sm:$0xff]  ;;  %v175_v48 = vld [vmem:[%s1261_s1 + $0xf0] sm:$0xff]  ;;  %v176_v49 = vld [vmem:[%s1261_s1 + $0xf8] sm:$0xff] }
  0x17   : > { %s600_s23 = sshll.u32 %s138_s17, 3  ;;  %v767_v50 = vpack.c.bf16 %v158_v47, %v157_v46  ;;  %v769_v51 = vpack.c.bf16 %v176_v49, %v175_v48  ;;  %v159_v52 = vld [vmem:[%s1261_s1 + $0x70] sm:$0xff]  ;;  %v160_v53 = vld [vmem:[%s1261_s1 + $0x78] sm:$0xff] }
  0x18   : > { %s1103_s6 = scalar_lea.vmem %s1260_s0, %s600_s23  ;;  %v771_v55 = vpack.c.bf16 %v160_v53, %v159_v52 }
  0x19   : > { %v177_v28 = vld [vmem:[%s1103_s6] ss:$4 sm:$0x3]  ;;  %v593_v30 = vld [vmem:[%s1103_s6 + $0x1] ss:$4 sm:$0x3]  ;;  %752 = vmatpush3.bf16.msra.mxu0 %v1110_v22  ;;  %784 = vmatpush3.bf16.msra.mxu1 %v1110_v22 }
  0x1a   : > { %v186_v29 = vrot.slane %v177_v28, %v1106_v21  ;;  %v271_v32 = vrot.slane %v593_v30, %v1106_v21  ;;  %754 = vmatprep.subr.bf16.mxu0 %v1114_v23  ;;  %786 = vmatprep.subr.bf16.mxu1 %v1114_v23  ;;  %v182_v56 = vrot.slane %v177_v28, %v181_v54  ;;  %v594_v58 = vld [vmem:[%s1103_s6 + $0x2] ss:$4 sm:$0x3]  ;;  %v595_v59 = vld [vmem:[%s1103_s6 + $0x3] ss:$4 sm:$0x3] }
  0x1b   : > { %v267_v57 = vrot.slane %v593_v30, %v181_v54  ;;  %v355_v60 = vrot.slane %v594_v58, %v1106_v21  ;;  %v439_v61 = vrot.slane %v595_v59, %v1106_v21  ;;  %v351_v62 = vrot.slane %v594_v58, %v181_v54  ;;  %s134_s6 = sand.u32 1, %s963_s10  }
  0x1c   : > { %253 = vmatprep.mubr.f32.mxu0 %v186_v29  ;;  %338 = vmatprep.mubr.f32.mxu1 %v271_v32  ;;  %v435_v63 = vrot.slane %v595_v59, %v181_v54  ;;  %s590_s7 = sshll.u32 %s134_s6, 3  ;;  %s514_s13 = scalar_lea.sflag [#allocation3], %s134_s6 }
  0x1d   : > { %756 = vmatpush3.bf16.msra.mxu0 %v1133_v31  ;;  %788 = vmatpush3.bf16.msra.mxu1 %v1133_v31  ;;  %s136_s8 = scalar_lea.vmem [#allocation2], %s590_s7 }
  0x1e   : > { %758 = vmatprep.subr.bf16.mxu0 %v1138_v33  ;;  %790 = vmatprep.subr.bf16.mxu1 %v1138_v33  ;;  %143 = vst.msk [vmem:[%s136_s8] sm:$0x3] %vm142_vm0, %v973_v0  ;;  %144 = vst.msk [vmem:[%s136_s8 + $0x6] sm:$0x3] %vm142_vm0, %v973_v0  ;;  %s527_s16 = sshll.u32 %s136_s8, 4  ;;  %s1218_s16 = int_to_ptr.vmem [resolvable:$true] %s527_s16 }
  0x1f   : > { %s909_s23 = scalar_lea.vmem %s1218_s16, 128  ;;  %p916_p0 = scmp.lt.s32.totalorder %s1218_s16, %s914_s25 }
  0x20   : > { %p910_p11 = scmp.ne.s32.totalorder %s1218_s16, %s909_s23  ;;  %p917_p1 = scmp.lt.s32.totalorder %s915_s26, %s909_s23 }
  0x21   : > { %760 = vmatpush3.bf16.msra.mxu0 %v759_v38  ;;  %792 = vmatpush3.bf16.msra.mxu1 %v759_v38 }
  0x22   : > { %762 = vmatprep.subr.bf16.mxu0 %v761_v39  ;;  %794 = vmatprep.subr.bf16.mxu1 %v761_v39  ;;  %p911_p12 = pnand %p910_p11, %p1028_p5  ;;  %p918_p2 = por %p917_p1, %p916_p0 }
  0x24   : > { %p912_p13 = pneg %p911_p12 }
  0x25   : > { %764 = vmatpush3.bf16.msra.mxu0 %v763_v44  ;;  %796 = vmatpush3.bf16.msra.mxu1 %v763_v44 }
  0x26   : > { %766 = vmatprep.subr.bf16.mxu0 %v765_v45  ;;  %798 = vmatprep.subr.bf16.mxu1 %v765_v45  ;;  %p919_p3 = pnand %p918_p2, %p912_p13 }
  0x29   : > { %768 = vmatpush3.bf16.msra.mxu0 %v767_v50  ;;  %800 = vmatpush3.bf16.msra.mxu1 %v767_v50 }
  0x2a   : > { %770 = vmatprep.subr.bf16.mxu0 %v769_v51  ;;  %802 = vmatprep.subr.bf16.mxu1 %v769_v51 }
  0x2d   : > { %772 = vmatpush3.bf16.msra.mxu0 %v771_v55  ;;  %804 = vmatpush3.bf16.msra.mxu1 %v771_v55 }
  0x2e   : > { %806 = vmatprep.subr.bf16.mxu0 %v1048_v4  ;;  %838 = vmatprep.subr.bf16.mxu1 %v1048_v4 }
  0x30   : > { %254 = vmatmul.mubr.f32.vlgmr.msra.gmra.mrb[0].mxu0 %v182_v56  ;;  %339 = vmatmul.mubr.f32.vlgmr.msra.gmra.mrb[0].mxu1 %v267_v57 }
  0x31   : > { %808 = vmatpush3.bf16.msra.mxu0 %v1059_v8  ;;  %840 = vmatpush3.bf16.msra.mxu1 %v1059_v8 }
  0x32   : > { %810 = vmatprep.subr.bf16.mxu0 %v1061_v9  ;;  %842 = vmatprep.subr.bf16.mxu1 %v1061_v9 }
  0x33   : > { %422 = vmatprep.mubr.f32.mxu0 %v355_v60  ;;  %506 = vmatprep.mubr.f32.mxu1 %v439_v61 }
  0x35   : > { %812 = vmatpush3.bf16.msra.mxu0 %v1082_v15  ;;  %844 = vmatpush3.bf16.msra.mxu1 %v1082_v15 }
  0x36   : > { %814 = vmatprep.subr.bf16.mxu0 %v1086_v16  ;;  %846 = vmatprep.subr.bf16.mxu1 %v1086_v16 }
  0x39   : > { %816 = vmatpush3.bf16.msra.mxu0 %v1110_v22  ;;  %848 = vmatpush3.bf16.msra.mxu1 %v1110_v22 }
  0x3a   : > { %818 = vmatprep.subr.bf16.mxu0 %v1114_v23  ;;  %850 = vmatprep.subr.bf16.mxu1 %v1114_v23 }
  0x3d   : > { %820 = vmatpush3.bf16.msra.mxu0 %v1133_v31  ;;  %852 = vmatpush3.bf16.msra.mxu1 %v1133_v31 }
  0x3e   : > { %822 = vmatprep.subr.bf16.mxu0 %v1138_v33  ;;  %854 = vmatprep.subr.bf16.mxu1 %v1138_v33 }
  0x41   : > { %824 = vmatpush3.bf16.msra.mxu0 %v759_v38  ;;  %856 = vmatpush3.bf16.msra.mxu1 %v759_v38 }
  0x42   : > { %826 = vmatprep.subr.bf16.mxu0 %v761_v39  ;;  %858 = vmatprep.subr.bf16.mxu1 %v761_v39 }
  0x45   : > { %828 = vmatpush3.bf16.msra.mxu0 %v763_v44  ;;  %860 = vmatpush3.bf16.msra.mxu1 %v763_v44 }
  0x46   : > { %830 = vmatprep.subr.bf16.mxu0 %v765_v45  ;;  %862 = vmatprep.subr.bf16.mxu1 %v765_v45 }
  0x49   : > { %832 = vmatpush3.bf16.msra.mxu0 %v767_v50  ;;  %864 = vmatpush3.bf16.msra.mxu1 %v767_v50 }
  0x4a   : > { %834 = vmatprep.subr.bf16.mxu0 %v769_v51  ;;  %866 = vmatprep.subr.bf16.mxu1 %v769_v51 }
  0x4d   : > { %836 = vmatpush3.bf16.msra.mxu0 %v771_v55  ;;  %868 = vmatpush3.bf16.msra.mxu1 %v771_v55 }
  0x50   : > { %423 = vmatmul.mubr.f32.vlgmr.msra.gmra.mrb[2].mxu0 %v351_v62  ;;  %507 = vmatmul.mubr.f32.vlgmr.msra.gmra.mrb[2].mxu1 %v435_v63 }
 0x103   : > { %v633_v1 = vpop.f32.mrb[0].mxu0  ;;  %v668_v2 = vpop.f32.mrb[0].mxu1 }
 0x104   : > { %v634_v3 = vpop.f32.mrb[1].mxu0  ;;  %v669_v4 = vpop.f32.mrb[1].mxu1 }
 0x105   : > { %v635_v5 = vadd.f32 %v634_v3, %v633_v1  ;;  %v670_v6 = vadd.f32 %v669_v4, %v668_v2 }
 0x107   : > { %260 = vst.msk [vmem:[%s136_s8 + $0x2] sm:$0x1] %vm259_vm1, %v635_v5  ;;  %344 = vst.msk [vmem:[%s136_s8 + $0x3] sm:$0x1] %vm259_vm1, %v670_v6 }
 0x123   : > { %v703_v7 = vpop.f32.mrb[2].mxu0  ;;  %v738_v8 = vpop.f32.mrb[2].mxu1 }
 0x124   : > { %v704_v9 = vpop.f32.mrb[3].mxu0  ;;  %v739_v10 = vpop.f32.mrb[3].mxu1 }
 0x125   : > { %v705_v11 = vadd.f32 %v704_v9, %v703_v7  ;;  %v740_v12 = vadd.f32 %v739_v10, %v738_v8 }
 0x127   : > { %428 = vst.msk [vmem:[%s136_s8 + $0x4] sm:$0x1] %vm259_vm1, %v705_v11  ;;  %512 = vst.msk [vmem:[%s136_s8 + $0x5] sm:$0x1] %vm259_vm1, %v740_v12 }
 0x128   : > { %922 = shalt.err (!%p919_p3)
}
 0x129   : > { %s923_s27 = scalar_lea.hbm %s1216_s22, 128  ;;  %s927_s30 = scalar_lea.hbm %s1262_s2, 256 }
 0x12a   : > { %p924_p4 = scmp.ne.s32.totalorder %s1216_s22, %s923_s27  ;;  %p928_p9 = scmp.lt.u32.totalorder %s1216_s22, %s1262_s2 }
 0x12b   : > { %p929_p10 = scmp.lt.u32.totalorder %s927_s30, %s923_s27  ;;  %p931_p12 = scmp.lt.u32.totalorder %s923_s27, %s1216_s22 }
 0x12c   : > { %p925_p7 = pnand %p924_p4, %p1028_p5 }
 0x12d   : > { %p930_p11 = por %p929_p10, %p928_p9 }
 0x12e   : > { %p926_p8 = pneg %p925_p7 }
 0x12f   : > { %p932_p13 = por %p931_p12, %p930_p11 }
 0x131   : > { %p933_p0 = pnand %p932_p13, %p926_p8 }
 0x133   : > { %936 = shalt.err (!%p933_p0)
}
 0x134   : > { %869 = dma.vmem_to_hbm [thread:$0]  (%p1028_p5), %s1218_s16, 128, %s1216_s22, %s514_s13  }
 0x135 PF: > { %p875_p1 = scmp.ge.s32.totalorder %s971_s12, 2  ;;  %s539_s5 = sand.u32 1, %s959_s9  }
 0x136   : > { %s540_s6 = scalar_lea.sflag [#allocation3], %s539_s5 }
 0x137   : > { %p872_p2 = pnand %p875_p1, %p1032_p6 }
 0x139   : > { %954 = dma.done.wait (!%p872_p2), %s540_s6, 128  }
 0x13a   : > { %956 = vsyncadd (!%p872_p2), %s540_s6, 4294967168  ;;  %p12_p3 = scmp.ge.s32.totalorder %s1015_s15, 4   ;;  %s1265_s9 = smov %s963_s10 }
 0x13b   : > { %s1266_s10 = smov %s967_s11  ;;  %s1267_s11 = smov %s1026_s18 }
 0x13c   : > { %s1268_s12 = smov %s1015_s15  ;;  %14 = sbr.rel (!%p12_p3) target bundleno = 3 (0x3), region = 66 }
 0x143   :  { %545 = vsyncpa [#allocation3], 1 }
 0x144   :  { %547 = vsyncpa [#allocation3 + $0x1], 1 }

</bundles_post_ra>
